<compile_context>
chip_gen: v7x
topology: tpu7x:2x2x1
jax: 0.10.0
libtpu: 0.0.40
codegen_flags: <defaults>
</compile_context>

<pallas_src>
import jax
import jax.numpy as jnp
from jax.experimental import pallas as pl
from jax.experimental.pallas import tpu as pltpu

_NEG_INF = -1e30  # finite "-inf" for padded class columns (avoids inf-inf NaNs)


def _round_up(x: int, m: int) -> int:
    return ((x + m - 1) // m) * m


def _fused_heads_kernel(x_ref, w_ref, b_ref, o_ref):
    """One grid step = (batch tile i, head h): probs = softmax(x @ W_dn + b)."""
    x = x_ref[...]          # (TILE_B, D)   compute dtype (bf16 by default)
    w = w_ref[0]            # (D, N_pad)    compute dtype, pre-transposed
    b = b_ref[0]            # (1, N_pad)    f32, padded cols = -1e30

    logits = jnp.dot(x, w, preferred_element_type=jnp.float32) + b
    m = jnp.max(logits, axis=-1, keepdims=True)
    e = jnp.exp(logits - m)                       # padded cols -> exp(-1e30) == 0
    denom = jnp.sum(e, axis=-1, keepdims=True)
    # EUP approximate reciprocal + one Newton-Raphson refinement (error << 1e-5).
    r = pl.reciprocal(denom, approx=True)
    r = r * (2.0 - denom * r)
    o_ref[0] = (e * r).astype(o_ref.dtype)


def pack_classifier_params(params, interaction_embedding_dim,
                           compute_dtype=jnp.bfloat16):
    """Stack all heads into one padded, pre-transposed weight/bias slab.

    Returns (w_stack (H, D, N_pad), b_stack (H, 1, N_pad), n_classes, N_pad).
    """
    H = len(params)
    D = interaction_embedding_dim
    n_classes = [int(w.shape[0]) for (w, _) in params]
    n_pad = _round_up(max(n_classes), 128)

    w_stack = jnp.zeros((H, D, n_pad), compute_dtype)
    b_stack = jnp.full((H, 1, n_pad), _NEG_INF, jnp.float32)
    for h, (w, b) in enumerate(params):
        n = n_classes[h]
        w_stack = w_stack.at[h, :, :n].set(w.T.astype(compute_dtype))
        b_stack = b_stack.at[h, 0, :n].set(b.astype(jnp.float32))
    return w_stack, b_stack, tuple(n_classes), n_pad


def classifier_forward(x, packed, *, max_tile_b=256, compute_dtype=jnp.bfloat16):
    """Mirror of Classifier.forward: list of softmax(Linear(x)) per head."""
    w_stack, b_stack, n_classes, n_pad = packed
    H, D, _ = w_stack.shape
    B = x.shape[0]

    tile_b = min(max_tile_b, _round_up(B, 8))     # sublane-aligned batch tile
    b_pad = _round_up(B, tile_b)

    x_p = jnp.zeros((b_pad, D), compute_dtype).at[:B].set(x.astype(compute_dtype))

    grid = (b_pad // tile_b, H)                   # head axis fastest -> x not re-DMA'd
    out = pl.pallas_call(
        _fused_heads_kernel,
        out_shape=jax.ShapeDtypeStruct((H, b_pad, n_pad), jnp.float32),
        grid_spec=pltpu.PrefetchScalarGridSpec(
            num_scalar_prefetch=0,
            grid=grid,
            in_specs=[
                pl.BlockSpec((tile_b, D), lambda i, h: (i, 0)),        # x
                pl.BlockSpec((1, D, n_pad), lambda i, h: (h, 0, 0)),   # W (D, N_pad)
                pl.BlockSpec((1, 1, n_pad), lambda i, h: (h, 0, 0)),   # bias
            ],
            out_specs=pl.BlockSpec((1, tile_b, n_pad), lambda i, h: (h, i, 0)),
        ),
        compiler_params=pltpu.CompilerParams(
            dimension_semantics=("parallel", "parallel")),
    )(x_p, w_stack, b_stack)

    # TODO(synk): for vocab-sized heads (weight tile near the v7x 64 MiB VMEM limit)
    # this would need an N-tiled online softmax; unnecessary for classifier heads.
    return [out[h, :B, :n] for h, n in enumerate(n_classes)]


def init_classifier_params(key, interaction_embedding_dim, num_categories_list):
    """Deterministic init matching nn.Linear shapes: W (N, D), b (N,)."""
    params = []
    for i, n_cls in enumerate(num_categories_list):
        kw, kb = jax.random.split(jax.random.fold_in(key, i))
        bound = 1.0 / (interaction_embedding_dim ** 0.5)
        w = jax.random.uniform(
            kw, (n_cls, interaction_embedding_dim), jnp.float32, -bound, bound)
        b = jax.random.uniform(kb, (n_cls,), jnp.float32, -bound, bound)
        params.append((w, b))
    return params


if __name__ == "__main__":
    key = jax.random.PRNGKey(0)
    batch = 2
    interaction_embedding_dim = 32
    num_categories_list = [8, 16, 4]

    kx, kp = jax.random.split(key)
    x = jax.random.normal(kx, (batch, interaction_embedding_dim), jnp.float32)
    params = init_classifier_params(kp, interaction_embedding_dim, num_categories_list)

    packed = pack_classifier_params(params, interaction_embedding_dim)
    outputs = classifier_forward(x, packed)
    outputs = [jax.block_until_ready(o) for o in outputs]

    # pure-JAX f32 reference for structural correctness (bf16 matmul -> loose atol)
    refs = [jax.nn.softmax(x @ w.T + b, axis=1) for (w, b) in params]

    for o, ref, n_cls in zip(outputs, refs, num_categories_list):
        assert o.shape == (batch, n_cls), o.shape
        assert jnp.allclose(jnp.sum(o, axis=-1), 1.0, atol=1e-4)
        assert jnp.allclose(o, ref, atol=5e-2), float(jnp.max(jnp.abs(o - ref)))

    print("KERNEL_OK")
</pallas_src>

<mosaic_0001>
module attributes {stable_mosaic.version = 11 : i64} {
  func.func @_fused_heads_kernel(%arg0: i32, %arg1: i32, %arg2: memref<8x32xbf16, #tpu.memory_space<vmem>>, %arg3: memref<1x32x128xbf16, #tpu.memory_space<vmem>>, %arg4: memref<1x1x128xf32, #tpu.memory_space<vmem>>, %arg5: memref<1x8x128xf32, #tpu.memory_space<vmem>>) attributes {dimension_semantics = [#tpu.dimension_semantics<parallel>, #tpu.dimension_semantics<parallel>], iteration_bounds = array<i64: 1, 3>, scalar_prefetch = 0 : i64, scratch_operands = 0 : i64, tpu.core_type = #tpu.core_type<tc>, window_params = [{transform_indices = @transform_0, window_bounds = array<i64: 8, 32>}, {transform_indices = @transform_1, window_bounds = array<i64: 1, 32, 128>}, {transform_indices = @transform_2, window_bounds = array<i64: 1, 1, 128>}, {transform_indices = @transform_3, window_bounds = array<i64: 1, 8, 128>}]} {
    %c0 = arith.constant 0 : index
    %c0_0 = arith.constant 0 : index
    %0 = vector.load %arg2[%c0, %c0_0] : memref<8x32xbf16, #tpu.memory_space<vmem>>, vector<8x32xbf16>
    %c0_1 = arith.constant 0 : index
    %c0_2 = arith.constant 0 : index
    %c0_3 = arith.constant 0 : index
    %1 = vector.load %arg3[%c0_1, %c0_2, %c0_3] : memref<1x32x128xbf16, #tpu.memory_space<vmem>>, vector<1x32x128xbf16>
    %2 = vector.shape_cast %1 : vector<1x32x128xbf16> to vector<32x128xbf16>
    %c0_4 = arith.constant 0 : index
    %c0_5 = arith.constant 0 : index
    %c0_6 = arith.constant 0 : index
    %3 = vector.load %arg4[%c0_4, %c0_5, %c0_6] : memref<1x1x128xf32, #tpu.memory_space<vmem>>, vector<1x1x128xf32>
    %4 = vector.shape_cast %3 : vector<1x1x128xf32> to vector<1x128xf32>
    %cst = arith.constant dense<0.000000e+00> : vector<8x128xf32>
    %5 = tpu.matmul %0, %2, %cst {dimension_numbers = #tpu.dot_dimension_numbers<[1], [0], [0], [1], [0, 0, 1, 1], [], []>} : vector<8x32xbf16>, vector<32x128xbf16>, vector<8x128xf32> -> vector<8x128xf32>
    %6 = vector.broadcast %4 : vector<1x128xf32> to vector<8x128xf32>
    %7 = arith.addf %5, %6 : vector<8x128xf32>
    %cst_7 = arith.constant dense<0xFF800000> : vector<8xf32>
    %8 = vector.multi_reduction <maximumf>, %7, %cst_7 [1] : vector<8x128xf32> to vector<8xf32>
    %9 = vector.shape_cast %8 : vector<8xf32> to vector<8x1xf32>
    %10 = vector.broadcast %9 : vector<8x1xf32> to vector<8x128xf32>
    %11 = arith.subf %7, %10 : vector<8x128xf32>
    %12 = math.exp %11 : vector<8x128xf32>
    %cst_8 = arith.constant dense<0.000000e+00> : vector<8xf32>
    %13 = vector.multi_reduction <add>, %12, %cst_8 [1] : vector<8x128xf32> to vector<8xf32>
    %14 = vector.shape_cast %13 : vector<8xf32> to vector<8x1xf32>
    %15 = tpu.reciprocal %14 {approx = true} : vector<8x1xf32> -> vector<8x1xf32>
    %16 = arith.mulf %14, %15 : vector<8x1xf32>
    %cst_9 = arith.constant 2.000000e+00 : f32
    %17 = vector.broadcast %cst_9 : f32 to vector<8x1xf32>
    %18 = arith.subf %17, %16 : vector<8x1xf32>
    %19 = arith.mulf %15, %18 : vector<8x1xf32>
    %20 = vector.broadcast %19 : vector<8x1xf32> to vector<8x128xf32>
    %21 = arith.mulf %12, %20 : vector<8x128xf32>
    %c0_10 = arith.constant 0 : index
    %c0_11 = arith.constant 0 : index
    %c0_12 = arith.constant 0 : index
    %22 = vector.load %arg5[%c0_10, %c0_11, %c0_12] : memref<1x8x128xf32, #tpu.memory_space<vmem>>, vector<1x8x128xf32>
    %23 = vector.shape_cast %22 : vector<1x8x128xf32> to vector<8x128xf32>
    %24 = vector.shape_cast %21 : vector<8x128xf32> to vector<1x8x128xf32>
    tpu.vector_store %arg5[%c0_10, %c0_11, %c0_12], %24 {strides = array<i32>} : memref<1x8x128xf32, #tpu.memory_space<vmem>>, vector<1x8x128xf32>,
    return
  }
  func.func @transform_0(%arg0: i32, %arg1: i32) -> (i32, i32) {
    %c0_i32 = arith.constant 0 : i32
    %c0_i32_0 = arith.constant 0 : i32
    return %arg0, %c0_i32 : i32, i32
  }
  func.func @transform_1(%arg0: i32, %arg1: i32) -> (i32, i32, i32) {
    %c0_i32 = arith.constant 0 : i32
    %c0_i32_0 = arith.constant 0 : i32
    %c0_i32_1 = arith.constant 0 : i32
    return %arg1, %c0_i32, %c0_i32_0 : i32, i32, i32
  }
  func.func @transform_2(%arg0: i32, %arg1: i32) -> (i32, i32, i32) {
    %c0_i32 = arith.constant 0 : i32
    %c0_i32_0 = arith.constant 0 : i32
    %c0_i32_1 = arith.constant 0 : i32
    return %arg1, %c0_i32, %c0_i32_0 : i32, i32, i32
  }
  func.func @transform_3(%arg0: i32, %arg1: i32) -> (i32, i32, i32) {
    %c0_i32 = arith.constant 0 : i32
    %c0_i32_0 = arith.constant 0 : i32
    return %arg1, %arg0, %c0_i32 : i32, i32, i32
  }
}

</mosaic_0001>

<bundles_post_ra>
// kernel: tpu_custom_call.1
= control target key start
LH: loop header
LB: loop body
LE: loop exit
PB: predicated region body
PF: predicated region fallthrough
CT: control target
= control target key end

     0   :  { %8 = vsyncpa [#allocation3], 0  ;;  %s947_s0 = inlined_call_operand.hbm [shape: bf16[8,32], index: 0, kind: input, shape index: {}]   ;;  %s948_s1 = inlined_call_operand.hbm [shape: bf16[3,32,128], index: 1, kind: input, shape index: {}]   ;;  %s949_s2 = inlined_call_operand.vmem [shape: f32[3,1,128], index: 2, kind: input, shape index: {}]   ;;  %s950_s3 = inlined_call_operand.hbm [shape: f32[3,8,128], index: 3, kind: output, shape index: {}]  }
   0x1   :  { %9 = vsyncpa [#allocation6], 0 }
   0x2   :  { %11 = vsyncpa [#allocation6 + $0x1], 0 }
   0x3   :  { %12 = vsyncpa [#allocation4], 0 }
   0x4   :  { %14 = vsyncpa [#allocation4 + $0x1], 0  ;;  %s724_s12 = smov 0   ;;  %s726_s13 = smov 0  }
   0x5   :  { %s728_s14 = smov 0   ;;  %s730_s15 = smov 0  }
   0x6   :  { %s732_s16 = smov 0   ;;  %s734_s17 = smov 0  }
   0x7 LB: > { %s436_s18 = sadd.s32 4294967295, %s695_s17   ;;  %s437_s19 = sadd.s32 4294967294, %s695_s17   ;;  %s695_s17 = sphi %s734_s17, %s20_s17   ;;  %s691_s16 = sphi %s732_s16, %s977_s16   ;;  %s687_s15 = sphi %s730_s15, %s976_s15   ;;  %s683_s14 = sphi %s728_s14, %s975_s14   ;;  %s679_s13 = sphi %s726_s13, %s974_s13   ;;  %s675_s12 = sphi %s724_s12, %s973_s12  }
   0x8   : > { %s65_s20 = sadd.s32 1, %s683_s14  ;;  %p72_p0 = scmp.ne.s32.totalorder %s683_s14, %s679_s13 }
   0x9   : > { %p73_p1 = scmp.eq.s32.totalorder %s695_s17, 0  ;;  %p78_p2 = scmp.ne.s32.totalorder %s679_s13, %s675_s12 }
   0xa   : > { %p762_p3 = scmp.eq.s32.totalorder %s436_s18, 0  ;;  %p130_p4 = scmp.eq.s32.totalorder %s436_s18, 2 }
   0xb   : > { %p766_p5 = por %p73_p1, %p72_p0  ;;  %p136_p6 = scmp.eq.s32.totalorder %s437_s19, 2 }
   0xc   : > { %s957_s21 = scalar_select %p762_p3, 1, 0 }
   0xd   : > { %p772_p7 = por %p762_p3, %p78_p2  ;;  %p776_p8 = por %p130_p4, %p72_p0 }
   0xe   : > { %p780_p9 = por %p136_p6, %p78_p2  ;;  %p438_p10 = scmp.ge.s32.totalorder %s695_s17, 1 }
   0xf   : > { %s959_s23 = scalar_select %p772_p7, 1, 0 }
  0x10   : > { %s960_s24 = scalar_select %p776_p8, 1, 0 }
  0x11   : > { %s961_s25 = scalar_select %p780_p9, 1, 0 }
  0x12   : > { %p143_p11 = scmp.lt.s32.totalorder %s695_s17, 4  ;;  %s697_s27 = smov [#allocation2]  }
  0x13   : > { %s158_s28 = sshll.u32 %s697_s27, 4  ;;  %p489_p13 = scmp.lt.s32.totalorder %s695_s17, 3  ;;  %s159_s28 = int_to_ptr.vmem [resolvable:$true] %s158_s28 }
  0x14   : > { %p786_p12 = pnand %p438_p10, %p143_p11  ;;  %s29_s4 = sadd.s32 1, %s691_s16 }
  0x15   : > { %p795_p1 = pnand %p489_p13, %p766_p5  ;;  %p806_p4 = scmp.ge.s32.totalorder %s29_s4, 3 }
  0x16   : > { %s962_s26 = scalar_select %p786_p12, 1, 0 }
  0x17   : > { %p476_p0 = pneg %p786_p12  ;;  %s169_s6 = sand.u32 1, %s683_s14  }
  0x18   : > { %s963_s29 = scalar_select %p795_p1, 1, 0 }
  0x19   : > { %p801_p2 = pnand %p476_p0, %p762_p3  ;;  %s551_s9 = scalar_lea.hbm %s947_s0, 64 }
  0x1a   : > { %s965_s5 = scalar_select %p806_p4, 1, 0 }
  0x1b   : > { %p552_p5 = scmp.ne.s32.totalorder %s947_s0, %s551_s9  ;;  %p553_p6 = pneg %p801_p2 }
  0x1c   : > { %p558_p13 = scmp.lt.u32.totalorder %s551_s9, %s947_s0 }
  0x1d   : > { %p554_p10 = pnand %p553_p6, %p552_p5 }
  0x1f   : > { %p555_p11 = pneg %p554_p10 }
  0x21   : > { %p560_p0 = pnand %p558_p13, %p555_p11 }
  0x23   : > { %563 = shalt.err (!%p560_p0)
}
  0x24   : > { %s564_s22 = scalar_lea.vmem %s159_s28, 64  ;;  %p572_p3 = scmp.lt.s32.totalorder %s159_s28, %s159_s28 }
  0x25   : > { %p565_p9 = scmp.ne.s32.totalorder %s159_s28, %s564_s22  ;;  %p573_p12 = scmp.lt.s32.totalorder %s564_s22, %s564_s22 }
  0x27   : > { %p567_p8 = pnand %p565_p9, %p553_p6  ;;  %p574_p1 = por %p573_p12, %p572_p3 }
  0x29   : > { %p568_p7 = pneg %p567_p8 }
  0x2b   : > { %p575_p4 = pnand %p574_p1, %p568_p7 }
  0x2d   : > { %578 = shalt.err (!%p575_p4)
}
  0x2e   : > { %479 = dma.hbm_to_vmem [thread:$0]  (!%p801_p2), %s947_s0, 64, %s159_s28, [#allocation3]  }
  0x2f   : > { %p966_p9 = scmp.ne.s32.totalorder %s965_s5, 0  ;;  %s441_s8 = sshll.u32 %s169_s6, 4 }
  0x30   : > { %s456_s10 = sshll.u32 %s691_s16, 8  ;;  %s173_s19 = scalar_lea.vmem [#allocation5], %s441_s8 }
  0x31   : > { %s979_s4 = smov (%p966_p9, %s29_s4), 0  ;;  %s837_s18 = scalar_lea.hbm %s948_s1, %s456_s10 }
  0x32   : > { %s62_s9 = ssub.s32 %s691_s16, %s979_s4  ;;  %s180_s22 = sshll.u32 %s173_s19, 4  ;;  %s844_s22 = int_to_ptr.vmem [resolvable:$true] %s180_s22 }
  0x33   : > { %p63_p3 = scmp.eq.s32.totalorder %s62_s9, 0  ;;  %s846_s5 = scalar_lea.sflag [#allocation6], %s169_s6 }
  0x34   : > { %s579_s27 = scalar_lea.hbm %s837_s18, 256  ;;  %p967_p8 = scmp.ne.s32.totalorder %s963_s29, 0 }
  0x35   : > { %s842_s28 = scalar_select %p63_p3, %s683_s14, %s65_s20  }
  0x36   : > { %p580_p7 = scmp.ne.s32.totalorder %s837_s18, %s579_s27  ;;  %p581_p12 = pneg %p967_p8 }
  0x37   : > { %s584_s8 = scalar_lea.hbm %s948_s1, 768  ;;  %p585_p4 = scmp.lt.u32.totalorder %s837_s18, %s948_s1 }
  0x38   : > { %p582_p1 = pnand %p581_p12, %p580_p7  ;;  %p586_p5 = scmp.lt.u32.totalorder %s584_s8, %s579_s27 }
  0x39   : > { %p588_p10 = scmp.lt.u32.totalorder %s579_s27, %s837_s18 }
  0x3a   : > { %p583_p2 = pneg %p582_p1  ;;  %p587_p6 = por %p586_p5, %p585_p4 }
  0x3c   : > { %p589_p11 = por %p588_p10, %p587_p6 }
  0x3e   : > { %p590_p13 = pnand %p589_p11, %p583_p2 }
  0x40   : > { %593 = shalt.err (!%p590_p13)
}
  0x41   : > { %s594_s20 = scalar_lea.vmem %s844_s22, 256  ;;  %s698_s6 = smov [#allocation5]  }
  0x42   : > { %p595_p0 = scmp.ne.s32.totalorder %s844_s22, %s594_s20  ;;  %s599_s11 = sshll.u32 %s698_s6, 4  ;;  %s600_s11 = int_to_ptr.vmem [resolvable:$false] %s599_s11 }
  0x43   : > { %s601_s19 = scalar_lea.vmem %s600_s11, 512  ;;  %p602_p7 = scmp.lt.s32.totalorder %s844_s22, %s600_s11 }
  0x44   : > { %p597_p9 = pnand %p595_p0, %p581_p12  ;;  %p603_p1 = scmp.lt.s32.totalorder %s601_s19, %s594_s20 }
  0x46   : > { %p598_p3 = pneg %p597_p9  ;;  %p604_p4 = por %p603_p1, %p602_p7 }
  0x48   : > { %p605_p5 = pnand %p604_p4, %p598_p3 }
  0x4a   : > { %608 = shalt.err (!%p605_p5)
}
  0x4b   : > { %s699_s27 = smov 64   ;;  %s700_s7 = smov 4  }
  0x4c   : > { %483 = dma.hbm_to_vmem [thread:$0]  (!%p967_p8), %s837_s18, 256, %s844_s22, %s846_s5, %s699_s27, %s699_s27, %s700_s7  }
  0x4d   : > { %p968_p12 = scmp.ne.s32.totalorder %s962_s26, 0 }
  0x4e   : > { %p969_p2 = scmp.ne.s32.totalorder (!%p968_p12), %s957_s21, 0 }
  0x4f   : > { %198 = sbr.rel (%p968_p12) target bundleno = 646 (0x286), region = 32 }
  0x56   : > { %662 = dma.done.wait (%p969_p2), [#allocation3], 64  }
  0x57   : > { %664 = vsyncadd (%p969_p2), [#allocation3], 4294967232  ;;  %s881_s9 = sand.u32 1, %s679_s13   ;;  %p970_p6 = scmp.ne.s32.totalorder %s959_s23, 0 }
  0x58   : > { %s446_s8 = sshll.u32 %s881_s9, 4  ;;  %s205_s10 = scalar_lea.sflag [#allocation6], %s881_s9 }
  0x59   : > { %s208_s30 = scalar_lea.vmem [#allocation5], %s446_s8 }
  0x5a   : > { %666 = dma.done.wait (%p970_p6), %s205_s10, 256  }
  0x5b   : > { %668 = vsyncadd (%p970_p6), %s205_s10, 4294967040  ;;  %v701_v0 = vmov 0.0   ;;  %vm702_vm0 = vmmov 0   ;;  %v545_v1 = vld [vmem:[%s208_s30] sm:$0xff]   ;;  %v546_v2 = vld [vmem:[%s208_s30 + $0x8] sm:$0xff]   ;;  %vm262_vm1 = vcmask 261120  }
  0x5c   : > { %460 = vmatprep.subr.bf16.mxu0 %v701_v0  ;;  %464 = vmatprep.mubr.msk.bf16.mxu0 %vm702_vm0, %v701_v0  ;;  %v238_v3 = vld [vmem:[#allocation2] sm:$0xf]  ;;  %p234_p8 = scmp.lt.s32.totalorder %s687_s15, 2  ;;  %s447_s18 = sshll.u32 %s881_s9, 3 }
  0x5d   : > { %461 = vmatpush3.bf16.msra.mxu0 %v545_v1  ;;  %s453_s22 = sshll.u32 %s687_s15, 7  ;;  %s233_s5 = scalar_lea.vmem [#allocation7], %s447_s18 }
  0x5e   : > { %462 = vmatprep.subr.bf16.mxu0 %v701_v0  ;;  %s235_s21 = scalar_select %p234_p8, %s687_s15, 2 }
  0x5f   : > { %s334_s20 = sshll.u32 %s233_s5, 4  ;;  %s899_s19 = scalar_lea.hbm %s950_s3, %s453_s22  ;;  %s901_s20 = int_to_ptr.vmem [resolvable:$true] %s334_s20 }
  0x60   : > { %s236_s23 = scalar_lea.vmem %s949_s2, %s235_s21  ;;  %s320_s27 = scalar_lea.sflag [#allocation4], %s881_s9 }
  0x61   : > { %463 = vmatpush3.bf16.msra.mxu0 %v546_v2  ;;  %v448_v4 = vld [vmem:[%s236_s23] ss:$0 sm:$0xff]  ;;  %s609_s7 = scalar_lea.vmem %s901_s20, 128  ;;  %p971_p11 = scmp.ne.s32.totalorder %s960_s24, 0 }
  0x62   : > { %p610_p10 = scmp.ne.s32.totalorder %s901_s20, %s609_s7  ;;  %s703_s15 = smov [#allocation7]  }
  0x63   : > { %s613_s8 = sshll.u32 %s703_s15, 4  ;;  %s614_s8 = int_to_ptr.vmem [resolvable:$false] %s613_s8 }
  0x64   : > { %465 = vmatmul.mubr.msk.bf16.vlgmr.msra.gmra.mrb[0].mxu0 %vm262_vm1, %v238_v3  ;;  %p611_p13 = pnand %p610_p10, %p971_p11  ;;  %s615_s10 = scalar_lea.vmem %s614_s8, 256 }
  0x65   : > { %p616_p9 = scmp.lt.s32.totalorder %s901_s20, %s614_s8  ;;  %p617_p3 = scmp.lt.s32.totalorder %s615_s10, %s609_s7 }
  0x66   : > { %p612_p0 = pneg %p611_p13 }
  0x67   : > { %p618_p7 = por %p617_p3, %p616_p9 }
  0x69   : > { %p619_p1 = pnand %p618_p7, %p612_p0 }
 0x137   : > { %v300_v5 = vpop.f32.mrb[0].mxu0 }
 0x138   : > { %v301_v6 = vadd.f32 %v448_v4, %v300_v5  ;;  %v466_v7 = vpop.f32.mrb[1].mxu0 }
 0x139   : > { %v303_v8 = vpop.f32.mrb[2].mxu0 }
 0x13a   : > { %306 = vmax.xlane.f32.xlu0 %v301_v6  ;;  %v467_v9 = vpop.f32.mrb[3].mxu0 }
 0x1c7   : > { %v307_v10 = vpop.xlane.xlu0 %306 }
 0x1c8   : > { %v308_v11 = vsub.f32 %v301_v6, %v307_v10 }
 0x1ca   : > { %v309_v12 = vmul.f32 1.442695, %v308_v11 }
 0x1cc   : > { %547 = vpow2.f32 %v309_v12 }
 0x1d6   : > { %v548_v13 = vpop.eup %547 }
 0x1d7   : > { %311 = vadd.xlane.f32.xlu0 %v548_v13 }
 0x264   : > { %v312_v14 = vpop.xlane.xlu0 %311 }
 0x265   : > { %549 = vrcp.f32 %v312_v14 }
 0x26f   : > { %v550_v15 = vpop.eup %549 }
 0x270   : > { %v314_v16 = vmul.f32 %v550_v15, %v312_v14 }
 0x272   : > { %v315_v17 = vsub.f32 2.0, %v314_v16 }
 0x274   : > { %v316_v18 = vmul.f32 %v550_v15, %v315_v17 }
 0x276   : > { %v317_v19 = vmul.f32 %v548_v13, %v316_v18 }
 0x278   : > { %318 = vst [vmem:[%s233_s5] sm:$0xff] %v317_v19 }
 0x279   : > { %622 = shalt.err (!%p619_p1)
}
 0x27a   : > { %s623_s9 = scalar_lea.hbm %s899_s19, 128  ;;  %s627_s26 = scalar_lea.hbm %s950_s3, 384 }
 0x27b   : > { %p624_p4 = scmp.ne.s32.totalorder %s899_s19, %s623_s9  ;;  %p628_p2 = scmp.lt.u32.totalorder %s899_s19, %s950_s3 }
 0x27c   : > { %p629_p6 = scmp.lt.u32.totalorder %s627_s26, %s623_s9  ;;  %p631_p10 = scmp.lt.u32.totalorder %s623_s9, %s899_s19 }
 0x27d   : > { %p625_p5 = pnand %p624_p4, %p971_p11 }
 0x27e   : > { %p630_p8 = por %p629_p6, %p628_p2 }
 0x27f   : > { %p626_p12 = pneg %p625_p5 }
 0x280   : > { %p632_p13 = por %p631_p10, %p630_p8 }
 0x282   : > { %p633_p0 = pnand %p632_p13, %p626_p12 }
 0x284   : > { %636 = shalt.err (!%p633_p0)
}
 0x285   : > { %474 = dma.vmem_to_hbm [thread:$0]  (%p971_p11), %s901_s20, 128, %s899_s19, %s320_s27  }
 0x286 PF: > { %p491_p9 = scmp.ge.s32.totalorder %s695_s17, 2  ;;  %s346_s18 = sand.u32 1, %s675_s12  }
 0x287   : > { %p972_p3 = scmp.ne.s32.totalorder %s961_s25, 0  ;;  %s347_s22 = scalar_lea.sflag [#allocation4], %s346_s18 }
 0x289   : > { %p485_p7 = pnand %p491_p9, %p972_p3 }
 0x28b   : > { %670 = dma.done.wait (!%p485_p7), %s347_s22, 128  }
 0x28c   : > { %672 = vsyncadd (!%p485_p7), %s347_s22, 4294967168  ;;  %s20_s17 = sadd.s32 1, %s695_s17   ;;  %s973_s12 = smov %s679_s13 }
 0x28d   : > { %p17_p1 = scmp.ge.s32.totalorder %s20_s17, 5   ;;  %s974_s13 = smov %s683_s14 }
 0x28e   : > { %s975_s14 = smov %s842_s28  ;;  %s976_s15 = smov %s691_s16 }
 0x28f   : > { %s977_s16 = smov %s979_s4  ;;  %19 = sbr.rel (!%p17_p1) target bundleno = 7 (0x7), region = 86 }
 0x296   :  { %352 = vsyncpa [#allocation3], 1 }
 0x297   :  { %354 = vsyncpa [#allocation3 + $0x1], 1 }
 0x298   :  { %355 = vsyncpa [#allocation6], 1 }
 0x299   :  { %357 = vsyncpa [#allocation6 + $0x1], 1 }
 0x29a   :  { %358 = vsyncpa [#allocation4], 1 }
 0x29b   :  { %360 = vsyncpa [#allocation4 + $0x1], 1 }

</bundles_post_ra>
